<compile_context>
chip_gen: v7x
topology: tpu7x:2x2x1
jax: 0.10.0
libtpu: 0.0.40
codegen_flags: <defaults>
</compile_context>

<pallas_src>
import jax
import jax.numpy as jnp
from jax.experimental import pallas as pl
from jax.experimental.pallas import tpu as pltpu


_NEG = -1e30  # pad value for extra vocab columns: inert under max / exp


def _round_up(x, m):
    return (x + m - 1) // m * m


def _bigram_loss_kernel(idx_ref, tgt_ref, table_ref, logits_ref, psum_ref, pcnt_ref):
    tile_n = logits_ref.shape[0]
    vp = table_ref.shape[1]

    ids = idx_ref[...]                                              # (tile_n, 1) int32
    lane = jax.lax.broadcasted_iota(jnp.int32, (tile_n, vp), 1)     # (tile_n, vp)

    # ---- gather: one-hot(idx) @ table on the MXU (table is VMEM-resident) ----
    one_hot = (lane == ids).astype(jnp.float32)
    rows = jnp.dot(one_hot, table_ref[...],
                   preferred_element_type=jnp.float32,
                   precision=jax.lax.Precision.HIGHEST)             # (tile_n, vp)
    logits_ref[...] = rows

    # ---- cross-entropy over the tile (ignore_index = -1) ----
    tgt = tgt_ref[...]                                              # (tile_n, 1) int32
    m = jnp.max(rows, axis=-1, keepdims=True)                       # (tile_n, 1)
    lse = m + jnp.log(jnp.sum(jnp.exp(rows - m), axis=-1, keepdims=True))
    tgt_logit = jnp.sum(jnp.where(lane == tgt, rows, 0.0), axis=-1, keepdims=True)

    valid = (tgt != -1)
    loss_i = jnp.where(valid, lse - tgt_logit, 0.0)                 # (tile_n, 1)

    # per-block partials; reduced across blocks in the wrapper (keeps the grid parallel)
    psum_ref[...] = jnp.sum(loss_i, axis=0, keepdims=True)
    pcnt_ref[...] = jnp.sum(valid.astype(jnp.float32), axis=0, keepdims=True)


def _bigram_gather_kernel(idx_ref, table_ref, logits_ref):
    tile_n = logits_ref.shape[0]
    vp = table_ref.shape[1]
    ids = idx_ref[...]                                              # (tile_n, 1) int32
    lane = jax.lax.broadcasted_iota(jnp.int32, (tile_n, vp), 1)
    one_hot = (lane == ids).astype(jnp.float32)
    logits_ref[...] = jnp.dot(one_hot, table_ref[...],
                              preferred_element_type=jnp.float32,
                              precision=jax.lax.Precision.HIGHEST)


def bigram_forward(table, idx, targets=None, tile_n=256):
    """Pallas equivalent of Bigram.forward(idx, targets)."""
    V = table.shape[0]
    B, T = idx.shape
    N = B * T

    vp = _round_up(V, 128)                               # lane-pad vocab
    tile_n = _round_up(max(8, min(tile_n, N)), 8)        # sublane-aligned tile
    n_pad = _round_up(N, tile_n)
    num_blocks = n_pad // tile_n

    # Pad the table: extra columns get a large-negative value so they never affect
    # the softmax; extra rows are never gathered (idx < V).
    table_p = table.astype(jnp.float32)
    if vp != V:
        table_p = jnp.pad(table_p, ((0, vp - V), (0, vp - V)))
        table_p = table_p.at[:, V:].set(_NEG)

    idx_flat = idx.reshape(N).astype(jnp.int32)
    idx_p = jnp.pad(idx_flat, (0, n_pad - N)).reshape(n_pad, 1)

    table_spec = pl.BlockSpec((vp, vp), lambda b: (0, 0))      # resident across grid
    idx_spec = pl.BlockSpec((tile_n, 1), lambda b: (b, 0))
    out_spec = pl.BlockSpec((tile_n, vp), lambda b: (b, 0))    # sublane/lane-dense

    compiler_params = pltpu.CompilerParams(
        dimension_semantics=("parallel",),        # independent blocks -> megacore sharding
        vmem_limit_bytes=32 * 1024 * 1024,        # table (64 KiB @ V=128) + tiles fit easily
    )

    if targets is None:
        logits_p = pl.pallas_call(
            _bigram_gather_kernel,
            grid=(num_blocks,),
            in_specs=(idx_spec, table_spec),
            out_specs=out_spec,
            out_shape=jax.ShapeDtypeStruct((n_pad, vp), jnp.float32),
            compiler_params=compiler_params,
        )(idx_p, table_p)
        logits = logits_p[:N, :V].reshape(B, T, V)
        return logits, None

    tgt_flat = targets.reshape(N).astype(jnp.int32)
    tgt_p = jnp.pad(tgt_flat, (0, n_pad - N), constant_values=-1).reshape(n_pad, 1)

    logits_p, psum, pcnt = pl.pallas_call(
        _bigram_loss_kernel,
        grid=(num_blocks,),
        in_specs=(idx_spec, idx_spec, table_spec),
        out_specs=(
            out_spec,
            pl.BlockSpec((1, 1), lambda b: (b, 0)),   # per-block loss sum
            pl.BlockSpec((1, 1), lambda b: (b, 0)),   # per-block valid count
        ),
        out_shape=(
            jax.ShapeDtypeStruct((n_pad, vp), jnp.float32),
            jax.ShapeDtypeStruct((num_blocks, 1), jnp.float32),
            jax.ShapeDtypeStruct((num_blocks, 1), jnp.float32),
        ),
        compiler_params=compiler_params,
    )(idx_p, tgt_p, table_p)

    logits = logits_p[:N, :V].reshape(B, T, V)
    loss = jnp.sum(psum) / jnp.sum(pcnt)          # NaN if every target is ignored (matches PyTorch)
    return logits, loss


def _reference_forward(table, idx, targets):
    """Pure-JAX reference mirroring the PyTorch module."""
    logits = table[idx]                                        # (B, T, V)
    V = table.shape[0]
    lg = logits.reshape(-1, V)
    tg = targets.reshape(-1)
    logp = jax.nn.log_softmax(lg, axis=-1)
    safe_tg = jnp.where(tg == -1, 0, tg)
    nll = -jnp.take_along_axis(logp, safe_tg[:, None], axis=-1)[:, 0]
    mask = (tg != -1).astype(jnp.float32)
    loss = jnp.sum(nll * mask) / jnp.sum(mask)
    return logits, loss


if __name__ == "__main__":
    V = 128      # vocab_size
    B, T = 2, 8  # batch, sequence

    key = jax.random.PRNGKey(0)
    k_tab, k_idx, k_tgt = jax.random.split(key, 3)

    # PyTorch __init__ uses torch.zeros((V, V)); use a deterministic random table
    # so the gather / loss path is numerically non-trivial.
    table = 0.02 * jax.random.normal(k_tab, (V, V), dtype=jnp.float32)

    idx = jax.random.randint(k_idx, (B, T), 0, V, dtype=jnp.int32)
    targets = jax.random.randint(k_tgt, (B, T), 0, V, dtype=jnp.int32)
    # exercise ignore_index=-1 on a couple of positions
    targets = targets.at[0, 0].set(-1).at[1, 3].set(-1)

    ref_logits, ref_loss = _reference_forward(table, idx, targets)

    # --- training path (logits + loss) ---
    logits, loss = bigram_forward(table, idx, targets)
    jax.block_until_ready((logits, loss))
    assert jnp.allclose(logits, ref_logits, atol=1e-5), "logits mismatch"
    assert jnp.allclose(loss, ref_loss, atol=1e-5), "loss mismatch"

    # --- same path with a small tile so the grid has several independent blocks ---
    logits_mb, loss_mb = bigram_forward(table, idx, targets, tile_n=8)
    jax.block_until_ready((logits_mb, loss_mb))
    assert jnp.allclose(logits_mb, ref_logits, atol=1e-5), "multi-block logits mismatch"
    assert jnp.allclose(loss_mb, ref_loss, atol=1e-5), "multi-block loss mismatch"

    # --- exercise position padding (N not a multiple of the tile / sublane) ---
    idx_odd = jax.random.randint(k_idx, (2, 9), 0, V, dtype=jnp.int32)
    tgt_odd = jax.random.randint(k_tgt, (2, 9), 0, V, dtype=jnp.int32)
    ref_lo, ref_ls = _reference_forward(table, idx_odd, tgt_odd)
    lo, ls = bigram_forward(table, idx_odd, tgt_odd)
    jax.block_until_ready((lo, ls))
    assert jnp.allclose(lo, ref_lo, atol=1e-5), "padded logits mismatch"
    assert jnp.allclose(ls, ref_ls, atol=1e-5), "padded loss mismatch"

    # --- inference path: targets=None (loss is None, matching PyTorch) ---
    logits_only, loss_none = bigram_forward(table, idx, None)
    jax.block_until_ready(logits_only)
    assert loss_none is None
    assert jnp.allclose(logits_only, ref_logits, atol=1e-5), "gather-only logits mismatch"

    print("KERNEL_OK")
</pallas_src>

<mosaic_0001>
module attributes {stable_mosaic.version = 11 : i64} {
  func.func @_bigram_loss_kernel(%arg0: i32, %arg1: memref<16x1xi32, #tpu.memory_space<vmem>>, %arg2: memref<16x1xi32, #tpu.memory_space<vmem>>, %arg3: memref<128x128xf32, #tpu.memory_space<vmem>>, %arg4: memref<16x128xf32, #tpu.memory_space<vmem>>, %arg5: memref<1x1xf32, #tpu.memory_space<vmem>>, %arg6: memref<1x1xf32, #tpu.memory_space<vmem>>) attributes {dimension_semantics = [#tpu.dimension_semantics<parallel>], iteration_bounds = array<i64: 1>, scalar_prefetch = 0 : i64, scratch_operands = 0 : i64, tpu.core_type = #tpu.core_type<tc>, window_params = [{transform_indices = @transform_0, window_bounds = array<i64: 16, 1>}, {transform_indices = @transform_1, window_bounds = array<i64: 16, 1>}, {pipeline_mode = #tpu.pipeline_mode<synchronous>, transform_indices = @transform_2, window_bounds = array<i64: 128, 128>}, {transform_indices = @transform_3, window_bounds = array<i64: 16, 128>}, {transform_indices = @transform_4, window_bounds = array<i64: 1, 1>}, {transform_indices = @transform_5, window_bounds = array<i64: 1, 1>}]} {
    %c0 = arith.constant 0 : index
    %c0_0 = arith.constant 0 : index
    %0 = vector.load %arg1[%c0, %c0_0] : memref<16x1xi32, #tpu.memory_space<vmem>>, vector<16x1xi32>
    %1 = tpu.iota {dimensions = array<i32: 1>} : vector<16x128xi32>
    %2 = vector.broadcast %0 : vector<16x1xi32> to vector<16x128xi32>
    %3 = arith.cmpi eq, %1, %2 : vector<16x128xi32>
    %4 = arith.extui %3 : vector<16x128xi1> to vector<16x128xi32>
    %5 = arith.sitofp %4 : vector<16x128xi32> to vector<16x128xf32>
    %c0_1 = arith.constant 0 : index
    %c0_2 = arith.constant 0 : index
    %6 = vector.load %arg3[%c0_1, %c0_2] : memref<128x128xf32, #tpu.memory_space<vmem>>, vector<128x128xf32>
    %cst = arith.constant dense<0.000000e+00> : vector<16x128xf32>
    %7 = tpu.matmul %5, %6, %cst {dimension_numbers = #tpu.dot_dimension_numbers<[1], [0], [0], [1], [0, 0, 1, 1], [], []>, precision = #tpu.contract_precision<fp32>} : vector<16x128xf32>, vector<128x128xf32>, vector<16x128xf32> -> vector<16x128xf32>
    %c0_3 = arith.constant 0 : index
    %c0_4 = arith.constant 0 : index
    %8 = vector.load %arg4[%c0_3, %c0_4] : memref<16x128xf32, #tpu.memory_space<vmem>>, vector<16x128xf32>
    tpu.vector_store %arg4[%c0_3, %c0_4], %7 {strides = array<i32>} : memref<16x128xf32, #tpu.memory_space<vmem>>, vector<16x128xf32>,
    %c0_5 = arith.constant 0 : index
    %c0_6 = arith.constant 0 : index
    %9 = vector.load %arg2[%c0_5, %c0_6] : memref<16x1xi32, #tpu.memory_space<vmem>>, vector<16x1xi32>
    %cst_7 = arith.constant dense<0xFF800000> : vector<16xf32>
    %10 = vector.multi_reduction <maximumf>, %7, %cst_7 [1] : vector<16x128xf32> to vector<16xf32>
    %11 = vector.shape_cast %10 : vector<16xf32> to vector<16x1xf32>
    %12 = vector.broadcast %11 : vector<16x1xf32> to vector<16x128xf32>
    %13 = arith.subf %7, %12 : vector<16x128xf32>
    %14 = math.exp %13 : vector<16x128xf32>
    %cst_8 = arith.constant dense<0.000000e+00> : vector<16xf32>
    %15 = vector.multi_reduction <add>, %14, %cst_8 [1] : vector<16x128xf32> to vector<16xf32>
    %16 = vector.shape_cast %15 : vector<16xf32> to vector<16x1xf32>
    %17 = math.log %16 : vector<16x1xf32>
    %18 = arith.addf %11, %17 : vector<16x1xf32>
    %19 = vector.broadcast %9 : vector<16x1xi32> to vector<16x128xi32>
    %20 = arith.cmpi eq, %1, %19 : vector<16x128xi32>
    %cst_9 = arith.constant 0.000000e+00 : f32
    %21 = vector.broadcast %cst_9 : f32 to vector<16x128xf32>
    %22 = arith.select %20, %7, %21 : vector<16x128xi1>, vector<16x128xf32>
    %cst_10 = arith.constant dense<0.000000e+00> : vector<16xf32>
    %23 = vector.multi_reduction <add>, %22, %cst_10 [1] : vector<16x128xf32> to vector<16xf32>
    %24 = vector.shape_cast %23 : vector<16xf32> to vector<16x1xf32>
    %c-1_i32 = arith.constant -1 : i32
    %25 = vector.broadcast %c-1_i32 : i32 to vector<16x1xi32>
    %26 = arith.cmpi ne, %9, %25 : vector<16x1xi32>
    %27 = arith.subf %18, %24 : vector<16x1xf32>
    %cst_11 = arith.constant 0.000000e+00 : f32
    %28 = vector.broadcast %cst_11 : f32 to vector<16x1xf32>
    %29 = arith.select %26, %27, %28 : vector<16x1xi1>, vector<16x1xf32>
    %cst_12 = arith.constant dense<0.000000e+00> : vector<1xf32>
    %30 = vector.multi_reduction <add>, %29, %cst_12 [0] : vector<16x1xf32> to vector<1xf32>
    %31 = vector.shape_cast %30 : vector<1xf32> to vector<1x1xf32>
    %c0_13 = arith.constant 0 : index
    %c0_14 = arith.constant 0 : index
    %32 = vector.load %arg5[%c0_13, %c0_14] : memref<1x1xf32, #tpu.memory_space<vmem>>, vector<1x1xf32>
    tpu.vector_store %arg5[%c0_13, %c0_14], %31 {strides = array<i32>} : memref<1x1xf32, #tpu.memory_space<vmem>>, vector<1x1xf32>,
    %33 = arith.extui %26 : vector<16x1xi1> to vector<16x1xi32>
    %34 = arith.sitofp %33 : vector<16x1xi32> to vector<16x1xf32>
    %cst_15 = arith.constant dense<0.000000e+00> : vector<1xf32>
    %35 = vector.multi_reduction <add>, %34, %cst_15 [0] : vector<16x1xf32> to vector<1xf32>
    %36 = vector.shape_cast %35 : vector<1xf32> to vector<1x1xf32>
    %c0_16 = arith.constant 0 : index
    %c0_17 = arith.constant 0 : index
    %37 = vector.load %arg6[%c0_16, %c0_17] : memref<1x1xf32, #tpu.memory_space<vmem>>, vector<1x1xf32>
    tpu.vector_store %arg6[%c0_16, %c0_17], %36 {strides = array<i32>} : memref<1x1xf32, #tpu.memory_space<vmem>>, vector<1x1xf32>,
    return
  }
  func.func @transform_0(%arg0: i32) -> (i32, i32) {
    %c0_i32 = arith.constant 0 : i32
    %c0_i32_0 = arith.constant 0 : i32
    return %arg0, %c0_i32 : i32, i32
  }
  func.func @transform_1(%arg0: i32) -> (i32, i32) {
    %c0_i32 = arith.constant 0 : i32
    %c0_i32_0 = arith.constant 0 : i32
    return %arg0, %c0_i32 : i32, i32
  }
  func.func @transform_2(%arg0: i32) -> (i32, i32) {
    %c0_i32 = arith.constant 0 : i32
    %c0_i32_0 = arith.constant 0 : i32
    %c0_i32_1 = arith.constant 0 : i32
    return %c0_i32, %c0_i32_0 : i32, i32
  }
  func.func @transform_3(%arg0: i32) -> (i32, i32) {
    %c0_i32 = arith.constant 0 : i32
    %c0_i32_0 = arith.constant 0 : i32
    return %arg0, %c0_i32 : i32, i32
  }
  func.func @transform_4(%arg0: i32) -> (i32, i32) {
    %c0_i32 = arith.constant 0 : i32
    %c0_i32_0 = arith.constant 0 : i32
    return %arg0, %c0_i32 : i32, i32
  }
  func.func @transform_5(%arg0: i32) -> (i32, i32) {
    %c0_i32 = arith.constant 0 : i32
    %c0_i32_0 = arith.constant 0 : i32
    return %arg0, %c0_i32 : i32, i32
  }
}

</mosaic_0001>

<bundles_post_ra>
// kernel: tpu_custom_call.1
= control target key start
LH: loop header
LB: loop body
LE: loop exit
PB: predicated region body
PF: predicated region fallthrough
CT: control target
= control target key end

     0   :  { %11 = vsyncpa [#allocation3], 0  ;;  %s1903_s0 = inlined_call_operand.vmem [shape: s32[16,1], index: 0, kind: input, shape index: {}]   ;;  %s1904_s1 = inlined_call_operand.vmem [shape: s32[16,1], index: 1, kind: input, shape index: {}]   ;;  %s1905_s2 = inlined_call_operand.hbm [shape: f32[128,128], index: 2, kind: input, shape index: {}]   ;;  %s1906_s3 = inlined_call_operand.hbm [shape: f32[16,128], index: 3, kind: output, shape index: {0}]   ;;  %s1907_s4 = inlined_call_operand.hbm [shape: f32[1,1], index: 4, kind: output, shape index: {1}]   ;;  %s1908_s5 = inlined_call_operand.hbm [shape: f32[1,1], index: 5, kind: output, shape index: {2}]  }
   0x1   :  { %12 = vsyncpa [#allocation4], 0 }
   0x2   :  { %13 = vsyncpa [#allocation7], 0  ;;  %s1506_s18 = smov [#allocation2]   ;;  %s1412_s22 = scalar_lea.hbm %s1905_s2, 2048 }
   0x3   :  { %s23_s19 = sshll.u32 %s1506_s18, 4  ;;  %p1413_p0 = scmp.ne.s32.totalorder %s1905_s2, %s1412_s22  ;;  %s24_s19 = int_to_ptr.vmem [resolvable:$true] %s23_s19 }
   0x4   :  { %p1416_p1 = scmp.lt.u32.totalorder %s1412_s22, %s1905_s2 }
   0x6   :  { %p1418_p2 = pnand %p1416_p1, %p1413_p0 }
   0x8   :  { %1421 = shalt.err (!%p1418_p2)
}
   0x9   :  { %s1422_s27 = scalar_lea.vmem %s24_s19, 2048  ;;  %p1427_p4 = scmp.lt.s32.totalorder %s24_s19, %s24_s19 }
   0xa   :  { %p1423_p3 = scmp.ne.s32.totalorder %s24_s19, %s1422_s27  ;;  %p1428_p5 = scmp.lt.s32.totalorder %s1422_s27, %s1422_s27 }
   0xc   :  { %p1429_p6 = por %p1428_p5, %p1427_p4 }
   0xe   :  { %p1430_p7 = pnand %p1429_p6, %p1423_p3 }
  0x10   :  { %1433 = shalt.err (!%p1430_p7)
}
  0x11   :  { %s1507_s28 = smov 128   ;;  %s1508_s29 = smov 8  }
  0x12   :  { %29 = dma.hbm_to_vmem [thread:$0]  %s1905_s2, 2048, %s24_s19, [#allocation3], %s1507_s28, %s1507_s28, %s1508_s29  }
  0x13   :  { %1500 = dma.done.wait [#allocation3], 2048  }
  0x14   :  { %1501 = vsyncadd [#allocation3], 4294965248  ;;  %v1509_v0 = vmov 0   ;;  %v33_v1 = vld [vmem:[%s1903_s0] sm:$0xff]  ;;  %v50_v3 = vld [vmem:[#allocation2 + $0x8] sm:$0xff]  ;;  %vm793_vm6 = vcmask 7168  }
  0x15   :  { %1402 = vset.pattern.permute.xlu0 %v1509_v0  ;;  %1403 = vset.pattern.permute.xlu1 %v1509_v0  ;;  %v49_v2 = vld [vmem:[#allocation2] sm:$0xff]  ;;  %v51_v4 = vld [vmem:[#allocation2 + $0x10] sm:$0xff]  ;;  %v34_v5 = vld [vmem:[%s1903_s0 + $0x8] sm:$0xff]  ;;  %v69_v7 = vand.u32 4294901760, %v50_v3  ;;  %vm803_vm7 = vcmask 0  }
  0x16   :  { %38 = vperm.xlu0 %1402, %v33_v1   ;;  %v66_v6 = vand.u32 4294901760, %v49_v2  ;;  %v52_v8 = vld [vmem:[#allocation2 + $0x18] sm:$0xff]  ;;  %v72_v9 = vand.u32 4294901760, %v51_v4  ;;  %v53_v10 = vld [vmem:[#allocation2 + $0x20] sm:$0xff]  ;;  %v54_v12 = vld [vmem:[#allocation2 + $0x28] sm:$0xff] }
  0x17   :  { %v75_v11 = vand.u32 4294901760, %v52_v8  ;;  %v78_v14 = vand.u32 4294901760, %v53_v10  ;;  %v81_v15 = vand.u32 4294901760, %v54_v12  ;;  %v55_v17 = vld [vmem:[#allocation2 + $0x30] sm:$0xff]  ;;  %v56_v18 = vld [vmem:[#allocation2 + $0x38] sm:$0xff]  ;;  %v1573_v19 = vld [vmem:[%s1904_s1] sm:$0xff]  ;;  %v1623_v48 = vsub.f32 %v50_v3, %v69_v7 }
  0x18   :  { %v1566_v13 = vpack.c.bf16 %v69_v7, %v66_v6  ;;  %v84_v21 = vand.u32 4294901760, %v55_v17  ;;  %v87_v22 = vand.u32 4294901760, %v56_v18  ;;  %v57_v23 = vld [vmem:[#allocation2 + $0x40] sm:$0xff]  ;;  %v58_v24 = vld [vmem:[#allocation2 + $0x48] sm:$0xff]  ;;  %v1584_v25 = vsub.f32 %v51_v4, %v72_v9  ;;  %v1590_v27 = vld [vmem:[#allocation2 + $0x50] sm:$0xff] }
  0x19   :  { %v1568_v16 = vpack.c.bf16 %v75_v11, %v72_v9  ;;  %v1581_v20 = vpack.c.bf16 %v81_v15, %v78_v14  ;;  %v1586_v26 = vsub.f32 %v52_v8, %v75_v11  ;;  %v90_v31 = vand.u32 4294901760, %v57_v23  ;;  %v1598_v33 = vld [vmem:[#allocation2 + $0x58] sm:$0xff]  ;;  %v1612_v41 = vld [vmem:[#allocation2 + $0x60] sm:$0xff]  ;;  %v1619_v46 = vld [vmem:[#allocation2 + $0x68] sm:$0xff] }
  0x1a   :  { %41 = vperm.xlu0 %1402, %v34_v5   ;;  %1288 = vmatprep.subr.bf16.mxu0 %v1566_v13  ;;  %v183_v28 = vand.u32 4294901760, %v1584_v25  ;;  %v1596_v30 = vpack.c.bf16 %v87_v22, %v84_v21  ;;  %v93_v32 = vand.u32 4294901760, %v58_v24  ;;  %v1604_v37 = vsub.f32 %v53_v10, %v78_v14  ;;  %v1640_v58 = vld [vmem:[#allocation2 + $0x70] sm:$0xff]  ;;  %v64_v63 = vld [vmem:[#allocation2 + $0x78] sm:$0xff] }
  0x1b   :  { %1192 = vmatprep.subr.bf16.mxu1 %v1566_v13  ;;  %1290 = vmatpush3.bf16.msra.mxu0 %v1566_v13  ;;  %v190_v29 = vand.u32 4294901760, %v1586_v26  ;;  %v96_v38 = vand.u32 4294901760, %v1590_v27  ;;  %v1607_v39 = vsub.f32 %v54_v12, %v81_v15  ;;  %v99_v40 = vand.u32 4294901760, %v1598_v33 }
  0x1c   :  { %1194 = vmatpush3.bf16.msra.mxu1 %v1566_v13  ;;  %1292 = vmatprep.subr.bf16.mxu0 %v1568_v16  ;;  %v184_v35 = vsub.f32 %v1584_v25, %v183_v28  ;;  %v197_v44 = vand.u32 4294901760, %v1604_v37  ;;  %v1617_v45 = vpack.c.bf16 %v93_v32, %v90_v31  ;;  %v1621_v47 = vsub.f32 %v49_v2, %v66_v6 }
  0x1d   :  { %1196 = vmatprep.subr.bf16.mxu1 %v1568_v16  ;;  %v1600_v34 = vpack.c.bf16 %v190_v29, %v183_v28  ;;  %v191_v36 = vsub.f32 %v1586_v26, %v190_v29  ;;  %v204_v49 = vand.u32 4294901760, %v1607_v39  ;;  %v1629_v52 = vsub.f32 %v55_v17, %v84_v21 }
  0x1e   :  { %774 = vperm.xlu0 %1402, %v1573_v19   ;;  %v185_v42 = vand.u32 4294901760, %v184_v35  ;;  %v198_v51 = vsub.f32 %v1604_v37, %v197_v44  ;;  %v1631_v53 = vsub.f32 %v56_v18, %v87_v22  ;;  %v102_v54 = vand.u32 4294901760, %v1612_v41 }
  0x1f   :  { %1294 = vmatpush3.bf16.msra.mxu0 %v1568_v16  ;;  %v192_v43 = vand.u32 4294901760, %v191_v36  ;;  %v1634_v55 = vpack.c.bf16 %v204_v49, %v197_v44  ;;  %v205_v56 = vsub.f32 %v1607_v39, %v204_v49  ;;  %v105_v57 = vand.u32 4294901760, %v1619_v46 }
  0x20   :  { %1198 = vmatpush3.bf16.msra.mxu1 %v1568_v16  ;;  %1296 = vmatprep.subr.bf16.mxu0 %v1581_v20  ;;  %v199_v59 = vand.u32 4294901760, %v198_v51  ;;  %v211_v60 = vand.u32 4294901760, %v1629_v52  ;;  %v218_v61 = vand.u32 4294901760, %v1631_v53  ;;  %v1646_v62 = vpack.c.bf16 %v99_v40, %v96_v38 }
  0x21   :  { %1200 = vmatprep.subr.bf16.mxu1 %v1581_v20  ;;  %v1626_v50 = vpack.c.bf16 %v192_v43, %v185_v42  ;;  %v169_v0 = vand.u32 4294901760, %v1621_v47  ;;  %v176_v1 = vand.u32 4294901760, %v1623_v48  ;;  %v206_v2 = vand.u32 4294901760, %v205_v56 }
  0x22   :  { %v1650_v3 = vpack.c.bf16 %v218_v61, %v211_v60  ;;  %v212_v4 = vsub.f32 %v1629_v52, %v211_v60  ;;  %v219_v5 = vsub.f32 %v1631_v53, %v218_v61  ;;  %v1654_v6 = vsub.f32 %v57_v23, %v90_v31 }
  0x23   :  { %1298 = vmatpush3.bf16.msra.mxu0 %v1581_v20  ;;  %v108_v7 = vand.u32 4294901760, %v1640_v58  ;;  %v1657_v8 = vpack.c.bf16 %v206_v2, %v199_v59  ;;  %v1659_v9 = vsub.f32 %v58_v24, %v93_v32  ;;  %v111_v10 = vand.u32 4294901760, %v64_v63 }
  0x24   :  { %1202 = vmatpush3.bf16.msra.mxu1 %v1581_v20  ;;  %1300 = vmatprep.subr.bf16.mxu0 %v1596_v30  ;;  %v213_v11 = vand.u32 4294901760, %v212_v4  ;;  %v220_v12 = vand.u32 4294901760, %v219_v5  ;;  %v225_v14 = vand.u32 4294901760, %v1654_v6  ;;  %v1666_v15 = vpack.c.bf16 %v105_v57, %v102_v54 }
  0x25   :  { %1204 = vmatprep.subr.bf16.mxu1 %v1596_v30  ;;  %v170_v17 = vsub.f32 %v1621_v47, %v169_v0  ;;  %v177_v18 = vsub.f32 %v1623_v48, %v176_v1  ;;  %v232_v21 = vand.u32 4294901760, %v1659_v9  ;;  %v238_v24 = vsub.f32 %v1590_v27, %v96_v38 }
  0x26   :  { %v1671_v22 = vpack.c.bf16 %v220_v12, %v213_v11  ;;  %v226_v23 = vsub.f32 %v1654_v6, %v225_v14  ;;  %v245_v28 = vsub.f32 %v1598_v33, %v99_v40  ;;  %v1683_v42 = vpack.c.bf16 %v111_v10, %v108_v7 }
  0x27   :  { %1302 = vmatpush3.bf16.msra.mxu0 %v1596_v30  ;;  %v1676_v29 = vpack.c.bf16 %v232_v21, %v225_v14  ;;  %v233_v31 = vsub.f32 %v1659_v9, %v232_v21  ;;  %v239_v35 = vand.u32 4294901760, %v238_v24  ;;  %v171_v27 = vand.u32 4294901760, %v170_v17 }
  0x28   :  { %1206 = vmatpush3.bf16.msra.mxu1 %v1596_v30  ;;  %1304 = vmatprep.subr.bf16.mxu0 %v1617_v45  ;;  %v227_v32 = vand.u32 4294901760, %v226_v23  ;;  %v246_v36 = vand.u32 4294901760, %v245_v28  ;;  %v178_v38 = vand.u32 4294901760, %v177_v18  ;;  %v252_v49 = vsub.f32 %v1612_v41, %v102_v54 }
  0x29   :  { %1208 = vmatprep.subr.bf16.mxu1 %v1617_v45  ;;  %v234_v33 = vand.u32 4294901760, %v233_v31  ;;  %v240_v43 = vsub.f32 %v238_v24, %v239_v35  ;;  %v259_v56 = vsub.f32 %v1619_v46, %v105_v57  ;;  %v1319_v2 = vpack.c.bf16 %v176_v1, %v169_v0 }
  0x2a   :  { %v1685_v40 = vpack.c.bf16 %v246_v36, %v239_v35  ;;  %v247_v44 = vsub.f32 %v245_v28, %v246_v36  ;;  %v253_v61 = vand.u32 4294901760, %v252_v49  ;;  %v1223_v4 = vpack.c.bf16 %v178_v38, %v171_v27 }
  0x2b   :  { %1306 = vmatpush3.bf16.msra.mxu0 %v1617_v45  ;;  %v1688_v51 = vpack.c.bf16 %v234_v33, %v227_v32  ;;  %v241_v59 = vand.u32 4294901760, %v240_v43  ;;  %v260_v5 = vand.u32 4294901760, %v259_v56  ;;  %v266_v54 = vsub.f32 %v1640_v58, %v108_v7 }
  0x2c   :  { %1210 = vmatpush3.bf16.msra.mxu1 %v1617_v45  ;;  %1308 = vmatprep.subr.bf16.mxu0 %v1646_v62  ;;  %v248_v60 = vand.u32 4294901760, %v247_v44  ;;  %v254_v41 = vsub.f32 %v252_v49, %v253_v61  ;;  %v273_v46 = vsub.f32 %v64_v63, %v111_v10  ;;  %v1708_v10 = vpack.c.bf16 %v1623_v48, %v1621_v47 }
  0x2d   :  { %1212 = vmatprep.subr.bf16.mxu1 %v1646_v62  ;;  %v1698_v57 = vpack.c.bf16 %v260_v5, %v253_v61  ;;  %v261_v12 = vsub.f32 %v259_v56, %v260_v5  ;;  %v267_v17 = vand.u32 4294901760, %v266_v54  ;;  %v1712_v32 = vpack.c.bf16 %v1586_v26, %v1584_v25 }
  0x2e   :  { %v1695_v11 = vpack.c.bf16 %v248_v60, %v241_v59  ;;  %v255_v14 = vand.u32 4294901760, %v254_v41  ;;  %v274_v18 = vand.u32 4294901760, %v273_v46  ;;  %v1716_v35 = vpack.c.bf16 %v1607_v39, %v1604_v37 }
  0x2f   :  { %1310 = vmatpush3.bf16.msra.mxu0 %v1646_v62  ;;  %v262_v0 = vand.u32 4294901760, %v261_v12  ;;  %v268_v21 = vsub.f32 %v266_v54, %v267_v17  ;;  %v1720_v36 = vpack.c.bf16 %v1631_v53, %v1629_v52  ;;  %v1724_v27 = vpack.c.bf16 %v1659_v9, %v1654_v6 }
  0x30   :  { %1214 = vmatpush3.bf16.msra.mxu1 %v1646_v62  ;;  %1312 = vmatprep.subr.bf16.mxu0 %v1666_v15  ;;  %v1702_v1 = vpack.c.bf16 %v274_v18, %v267_v17  ;;  %v275_v23 = vsub.f32 %v273_v46, %v274_v18  ;;  %v1726_v38 = vpack.c.bf16 %v245_v28, %v238_v24  ;;  %v35_v25 = vlaneseq }
  0x31   :  { %1216 = vmatprep.subr.bf16.mxu1 %v1666_v15  ;;  %v1247_v31 = vpack.c.bf16 %v262_v0, %v255_v14  ;;  %v269_v58 = vand.u32 4294901760, %v268_v21  ;;  %v1728_v47 = vpack.c.bf16 %v259_v56, %v252_v49  ;;  %v1730_v48 = vpack.c.bf16 %v273_v46, %v266_v54 }
  0x32   :  { %v276_v63 = vand.u32 4294901760, %v275_v23  ;;  %v1732_v26 = vand.u32 127, %v35_v25  ;;  %v1510_v37 = vmov 0.0   ;;  %v1511_v56 = vmov 1.0  }
  0x33   :  { %1314 = vmatpush3.bf16.msra.mxu0 %v1666_v15  ;;  %vm787_vm4 = vcmp.ne.s32.totalorder %v1573_v19, 4294967295 }
  0x34   :  { %1218 = vmatpush3.bf16.msra.mxu1 %v1666_v15  ;;  %1316 = vmatprep.subr.bf16.mxu0 %v1683_v42  ;;  %v1704_v7 = vpack.c.bf16 %v276_v63, %v269_v58 }
  0x35   :  { %1220 = vmatprep.subr.bf16.mxu1 %v1683_v42 }
  0x37   :  { %1318 = vmatpush3.bf16.msra.mxu0 %v1683_v42 }
  0x38   :  { %1222 = vmatpush3.bf16.msra.mxu1 %v1683_v42  ;;  %1320 = vmatprep.subr.bf16.mxu0 %v1319_v2 }
  0x39   :  { %1224 = vmatprep.subr.bf16.mxu1 %v1223_v4 }
  0x95   :  { %v39_v33 = vpop.permute.xlu0 %38 }
  0x96   :  { %vm43_vm0 = vcmp.eq.s32.totalorder %v1732_v26, %v39_v33 }
  0x97   :  { %v863_v39 = vsel %vm43_vm0, 1.0, %v1510_v37 }
  0x98   :  { %v147_v52 = vsub.f32 %v863_v39, %v863_v39 }
  0x99   :  { %v1738_v53 = vpop.permute.xlu0 %41 }
  0x9a   :  { %vm44_vm1 = vcmp.eq.s32.totalorder %v1732_v26, %v1738_v53  ;;  %v148_v6 = vand.u32 4294901760, %v147_v52 }
  0x9b   :  { %v864_v9 = vsel %vm44_vm1, 1.0, %v1510_v37 }
  0x9c   :  { %v1746_v24 = vsub.f32 %v864_v9, %v864_v9  ;;  %1118 = vmatprep.mubr.f32.mxu0 %v148_v6  ;;  %v149_v28 = vsub.f32 %v147_v52, %v148_v6 }
  0x9e   :  { %v150_v43 = vand.u32 4294901760, %v149_v28  ;;  %v158_v44 = vand.u32 4294901760, %v1746_v24 }
  0xa0   :  { %1013 = vmatprep.mubr.f32.mxu1 %v150_v43  ;;  %1119 = vmatmul.mubr.f32.vlgmr.msra.gmra.mrb[0].mxu0 %v158_v44  ;;  %v159_v49 = vsub.f32 %v1746_v24, %v158_v44 }
  0xa1   :  { %1322 = vmatpush3.bf16.msra.mxu0 %v1319_v2  ;;  %1153 = vmatprep.mubr.msk.f32.mxu0 %vm43_vm0, %v1511_v56  ;;  %v871_v2 = vsel %vm787_vm4, 1.0, %v1510_v37 }
  0xa2   :  { %1324 = vmatprep.subr.bf16.mxu0 %v1600_v34  ;;  %v160_v59 = vand.u32 4294901760, %v159_v49  ;;  %v809_v5 = vsel %vm793_vm6, %v871_v2, 0.0 }
  0xa4   :  { %1014 = vmatmul.mubr.f32.vlgmr.msra.gmra.mrb[0].mxu1 %v160_v59 }
  0xa5   :  { %1226 = vmatpush3.bf16.msra.mxu1 %v1223_v4  ;;  %1326 = vmatpush3.bf16.msra.mxu0 %v1600_v34 }
  0xa6   :  { %1048 = vmatprep.mubr.msk.f32.mxu1 %vm43_vm0, %v1511_v56  ;;  %1228 = vmatprep.subr.bf16.mxu1 %v1626_v50 }
  0xa7   :  { %1328 = vmatprep.subr.bf16.mxu0 %v1634_v55 }
  0xa9   :  { %1230 = vmatpush3.bf16.msra.mxu1 %v1626_v50  ;;  %1330 = vmatpush3.bf16.msra.mxu0 %v1634_v55  ;;  %v1833_v50 = vld [vmem:[%s1904_s1 + $0x8] sm:$0xff]  ;;  %s1512_s1 = smov [#allocation5]  }
  0xaa   :  { %1232 = vmatprep.subr.bf16.mxu1 %v1657_v8  ;;  %1332 = vmatprep.subr.bf16.mxu0 %v1650_v3  ;;  %vm788_vm5 = vcmp.ne.s32.totalorder %v1833_v50, 4294967295  ;;  %s824_s13 = sshll.u32 %s1512_s1, 4  ;;  %s825_s13 = int_to_ptr.vmem [resolvable:$true] %s824_s13 }
  0xab   :  { %v872_v4 = vsel %vm788_vm5, 1.0, %v1510_v37  ;;  %s1434_s14 = scalar_lea.vmem %s825_s13, 256  ;;  %p1439_p9 = scmp.lt.s32.totalorder %s825_s13, %s825_s13 }
  0xac   :  { %p1435_p8 = scmp.ne.s32.totalorder %s825_s13, %s1434_s14  ;;  %p1440_p10 = scmp.lt.s32.totalorder %s1434_s14, %s1434_s14 }
  0xad   :  { %1234 = vmatpush3.bf16.msra.mxu1 %v1657_v8  ;;  %1334 = vmatpush3.bf16.msra.mxu0 %v1650_v3 }
  0xae   :  { %1236 = vmatprep.subr.bf16.mxu1 %v1671_v22  ;;  %1336 = vmatprep.subr.bf16.mxu0 %v1676_v29  ;;  %p1441_p11 = por %p1440_p10, %p1439_p9 }
  0xb0   :  { %p1442_p12 = pnand %p1441_p11, %p1435_p8 }
  0xb1   :  { %1238 = vmatpush3.bf16.msra.mxu1 %v1671_v22  ;;  %1338 = vmatpush3.bf16.msra.mxu0 %v1676_v29 }
  0xb2   :  { %1240 = vmatprep.subr.bf16.mxu1 %v1688_v51  ;;  %1340 = vmatprep.subr.bf16.mxu0 %v1685_v40 }
  0xb5   :  { %1242 = vmatpush3.bf16.msra.mxu1 %v1688_v51  ;;  %1342 = vmatpush3.bf16.msra.mxu0 %v1685_v40  ;;  %v775_v40 = vpop.permute.xlu0 %774 }
  0xb6   :  { %1244 = vmatprep.subr.bf16.mxu1 %v1695_v11  ;;  %1344 = vmatprep.subr.bf16.mxu0 %v1698_v57  ;;  %vm779_vm2 = vcmp.eq.s32.totalorder %v1732_v26, %v775_v40 }
  0xb9   :  { %1246 = vmatpush3.bf16.msra.mxu1 %v1695_v11  ;;  %1346 = vmatpush3.bf16.msra.mxu0 %v1698_v57  ;;  %v810_v11 = vsel %vm793_vm6, %v872_v4, 0.0 }
  0xba   :  { %1248 = vmatprep.subr.bf16.mxu1 %v1247_v31  ;;  %1348 = vmatprep.subr.bf16.mxu0 %v1702_v1  ;;  %v811_v41 = vadd.f32 %v810_v11, %v809_v5 }
  0xbc   :  { %v812_v54 = vrot.slane %v811_v41, 4 }
  0xbd   :  { %1250 = vmatpush3.bf16.msra.mxu1 %v1247_v31  ;;  %1350 = vmatpush3.bf16.msra.mxu0 %v1702_v1 }
  0xbe   :  { %1252 = vmatprep.subr.bf16.mxu1 %v1704_v7  ;;  %1352 = vmatprep.subr.bf16.mxu0 %v1566_v13  ;;  %v813_v46 = vadd.f32 %v812_v54, %v811_v41 }
  0xc0   :  { %1154 = vmatmul.mubr.msk.f32.vlgmr.msra.gmra.mrb[0].mxu0 %vm44_vm1, %v1511_v56  ;;  %v814_v57 = vrot.slane %v813_v46, 2 }
  0xc1   :  { %1254 = vmatpush3.bf16.msra.mxu1 %v1704_v7  ;;  %1354 = vmatpush3.bf16.msra.mxu0 %v1566_v13 }
  0xc2   :  { %1188 = vmatprep.mubr.msk.f32.mxu0 %vm43_vm0, %v1511_v56  ;;  %1256 = vmatprep.subr.bf16.mxu1 %v1708_v10  ;;  %v815_v12 = vadd.f32 %v814_v57, %v813_v46 }
  0xc3   :  { %1356 = vmatprep.subr.bf16.mxu0 %v1568_v16 }
  0xc4   :  { %1049 = vmatmul.mubr.msk.f32.vlgmr.msra.gmra.mrb[0].mxu1 %vm44_vm1, %v1511_v56  ;;  %v816_v14 = vrot.slane %v815_v12, 1 }
  0xc5   :  { %1258 = vmatpush3.bf16.msra.mxu1 %v1708_v10  ;;  %1083 = vmatprep.mubr.f32.mxu1 %v147_v52 }
  0xc6   :  { %1358 = vmatpush3.bf16.msra.mxu0 %v1568_v16  ;;  %1260 = vmatprep.subr.bf16.mxu1 %v1712_v32  ;;  %v817_v17 = vadd.f32 %v816_v14, %v815_v12 }
  0xc7   :  { %1360 = vmatprep.subr.bf16.mxu0 %v1581_v20 }
  0xc8   :  { %818 = vst.msk [vmem:[#allocation8] sm:$0x1] %vm803_vm7, %v817_v17 }
  0xc9   :  { %1262 = vmatpush3.bf16.msra.mxu1 %v1712_v32 }
  0xca   :  { %1362 = vmatpush3.bf16.msra.mxu0 %v1581_v20  ;;  %1264 = vmatprep.subr.bf16.mxu1 %v1716_v35 }
  0xcb   :  { %1364 = vmatprep.subr.bf16.mxu0 %v1596_v30 }
  0xcd   :  { %1266 = vmatpush3.bf16.msra.mxu1 %v1716_v35 }
  0xce   :  { %1366 = vmatpush3.bf16.msra.mxu0 %v1596_v30  ;;  %1268 = vmatprep.subr.bf16.mxu1 %v1720_v36 }
  0xcf   :  { %1368 = vmatprep.subr.bf16.mxu0 %v1617_v45 }
  0xd1   :  { %1270 = vmatpush3.bf16.msra.mxu1 %v1720_v36 }
  0xd2   :  { %1370 = vmatpush3.bf16.msra.mxu0 %v1617_v45  ;;  %1272 = vmatprep.subr.bf16.mxu1 %v1724_v27 }
  0xd3   :  { %1372 = vmatprep.subr.bf16.mxu0 %v1646_v62 }
  0xd5   :  { %1274 = vmatpush3.bf16.msra.mxu1 %v1724_v27 }
  0xd6   :  { %1374 = vmatpush3.bf16.msra.mxu0 %v1646_v62  ;;  %1276 = vmatprep.subr.bf16.mxu1 %v1726_v38 }
  0xd7   :  { %1376 = vmatprep.subr.bf16.mxu0 %v1666_v15 }
  0xd9   :  { %1278 = vmatpush3.bf16.msra.mxu1 %v1726_v38 }
  0xda   :  { %1378 = vmatpush3.bf16.msra.mxu0 %v1666_v15  ;;  %1280 = vmatprep.subr.bf16.mxu1 %v1728_v47 }
  0xdb   :  { %1380 = vmatprep.subr.bf16.mxu0 %v1683_v42 }
  0xdd   :  { %1282 = vmatpush3.bf16.msra.mxu1 %v1728_v47 }
  0xde   :  { %1382 = vmatpush3.bf16.msra.mxu0 %v1683_v42  ;;  %1284 = vmatprep.subr.bf16.mxu1 %v1730_v48 }
  0xe1   :  { %1189 = vmatmul.mubr.msk.f32.vlgmr.msra.gmra.mrb[0].mxu0 %vm44_vm1, %v1511_v56  ;;  %1286 = vmatpush3.bf16.msra.mxu1 %v1730_v48 }
  0xe4   :  { %1084 = vmatmul.mubr.f32.vlgmr.msra.gmra.mrb[0].mxu1 %v1746_v24 }
 0x1b4   :  { %v1190_v13 = vpop.f32.mrb[0].mxu0 }
 0x1b5   :  { %v739_v16 = vpop.f32.mrb[1].mxu0 }
 0x1b7   :  { %v1085_v20 = vpop.f32.mrb[0].mxu1 }
 0x1b8   :  { %v1383_v30 = vadd.f32 %v1190_v13, %v1085_v20  ;;  %v423_v34 = vpop.f32.mrb[1].mxu1 }
 0x1b9   :  { %v1384_v45 = vadd.f32 %v739_v16, %v423_v34 }
 0x1ba   :  { %750 = vst [vmem:[#allocation5 + $0x8] sm:$0xff] %v1383_v30  ;;  %755 = vmax.xlane.f32.xlu1 %v1383_v30 }
 0x1bb   :  { %749 = vst [vmem:[#allocation5] sm:$0xff] %v1384_v45  ;;  %v781_v60 = vsel %vm779_vm2, %v1384_v45, 0.0 }
 0x1be   :  { %753 = vmax.xlane.f32.xlu1 %v1384_v45 }
 0x1cf   :  { %777 = vperm.xlu1 %1403, %v1833_v50  }
 0x247   :  { %v756_v55 = vpop.xlane.xlu1 %755 }
 0x248   :  { %v758_v62 = vsub.f32 %v1383_v30, %v756_v55 }
 0x24a   :  { %v761_v3 = vmul.f32 1.442695, %v758_v62 }
 0x24b   :  { %v754_v8 = vpop.xlane.xlu1 %753 }
 0x24c   :  { %1404 = vpow2.f32 %v761_v3  ;;  %v757_v15 = vsub.f32 %v1384_v45, %v754_v8 }
 0x24e   :  { %v759_v22 = vmul.f32 1.442695, %v757_v15 }
 0x24f   :  { %v778_v51 = vpop.permute.xlu1 %777 }
 0x250   :  { %1406 = vpow2.f32 %v759_v22  ;;  %vm780_vm3 = vcmp.eq.s32.totalorder %v1732_v26, %v778_v51 }
 0x251   :  { %v782_v61 = vsel %vm780_vm3, %v1383_v30, 0.0 }
 0x256   :  { %v1405_v29 = vpop.eup %1404 }
 0x257   :  { %765 = vadd.xlane.f32.xlu1 %v1405_v29 }
 0x25a   :  { %v1407_v42 = vpop.eup %1406 }
 0x25b   :  { %763 = vadd.xlane.f32.xlu0 %v1407_v42 }
 0x25f   :  { %783 = vadd.xlane.f32.xlu0 %v781_v60 }
 0x263   :  { %785 = vadd.xlane.f32.xlu0 %v782_v61 }
 0x264   :  { %1445 = shalt.err (!%p1442_p12)
}
 0x265   :  { %s1446_s17 = scalar_lea.hbm %s1906_s3, 256 }
 0x266   :  { %p1447_p13 = scmp.ne.s32.totalorder %s1906_s3, %s1446_s17  ;;  %p1450_p0 = scmp.lt.u32.totalorder %s1446_s17, %s1906_s3 }
 0x268   :  { %p1452_p1 = pnand %p1450_p0, %p1447_p13 }
 0x26a   :  { %1455 = shalt.err (!%p1452_p1)
}
 0x26b   :  { %830 = dma.vmem_to_hbm [thread:$0]  %s825_s13, 256, %s1906_s3, [#allocation4], %s1507_s28, %s1507_s28, %s1508_s29  }
 0x26c   :  { %s1513_s3 = smov [#allocation6]   ;;  %s1514_s25 = smov [#allocation8]  }
 0x26d   :  { %s837_s24 = sshll.u32 %s1513_s3, 4  ;;  %s847_s26 = sshll.u32 %s1514_s25, 4  ;;  %s838_s24 = int_to_ptr.vmem [resolvable:$true] %s837_s24  ;;  %s1870_s26 = int_to_ptr.vmem [resolvable:$true] %s847_s26 }
 0x26e   :  { %s1456_s27 = scalar_lea.vmem %s838_s24, 16  ;;  %s1460_s28 = scalar_lea.vmem %s838_s24, 32 }
 0x26f   :  { %p1457_p2 = scmp.ne.s32.totalorder %s838_s24, %s1456_s27  ;;  %p1461_p3 = scmp.lt.s32.totalorder %s838_s24, %s838_s24 }
 0x270   :  { %p1462_p4 = scmp.lt.s32.totalorder %s1460_s28, %s1456_s27 }
 0x272   :  { %p1463_p5 = por %p1462_p4, %p1461_p3 }
 0x274   :  { %p1464_p6 = pnand %p1463_p5, %p1457_p2 }
 0x2e4   :  { %v766_v18 = vpop.xlane.xlu1 %765 }
 0x2e5   :  { %1408 = vlog2.f32 %v766_v18 }
 0x2e8   :  { %v764_v0 = vpop.xlane.xlu0 %763 }
 0x2e9   :  { %1410 = vlog2.f32 %v764_v0 }
 0x2ec   :  { %v784_v1 = vpop.xlane.xlu0 %783 }
 0x2ef   :  { %v1409_v21 = vpop.eup %1408 }
 0x2f0   :  { %v770_v23 = vmul.f32 0.6931472, %v1409_v21  ;;  %v786_v63 = vpop.xlane.xlu0 %785 }
 0x2f2   :  { %v772_v31 = vadd.f32 %v770_v23, %v756_v55 }
 0x2f3   :  { %v1411_v58 = vpop.eup %1410 }
 0x2f4   :  { %v768_v7 = vmul.f32 0.6931472, %v1411_v58  ;;  %v790_v10 = vsub.f32 %v772_v31, %v786_v63 }
 0x2f6   :  { %v771_v32 = vadd.f32 %v768_v7, %v754_v8  ;;  %v792_v36 = vsel %vm788_vm5, %v790_v10, 0.0 }
 0x2f7   :  { %v795_v47 = vsel %vm793_vm6, %v792_v36, 0.0 }
 0x2f8   :  { %v789_v35 = vsub.f32 %v771_v32, %v784_v1 }
 0x2fa   :  { %v791_v27 = vsel %vm787_vm4, %v789_v35, 0.0 }
 0x2fb   :  { %v794_v38 = vsel %vm793_vm6, %v791_v27, 0.0 }
 0x2fc   :  { %v796_v48 = vadd.f32 %v795_v47, %v794_v38 }
 0x2fe   :  { %v797_v25 = vrot.slane %v796_v48, 4 }
 0x300   :  { %v798_v26 = vadd.f32 %v797_v25, %v796_v48 }
 0x302   :  { %v799_v33 = vrot.slane %v798_v26, 2 }
 0x304   :  { %v800_v37 = vadd.f32 %v799_v33, %v798_v26 }
 0x306   :  { %v801_v39 = vrot.slane %v800_v37, 1 }
 0x308   :  { %v802_v52 = vadd.f32 %v801_v39, %v800_v37 }
 0x30a   :  { %804 = vst.msk [vmem:[#allocation6] sm:$0x1] %vm803_vm7, %v802_v52 }
 0x30b   :  { %1467 = shalt.err (!%p1464_p6)
}
 0x30c   :  { %s1468_s6 = scalar_lea.hbm %s1907_s4, 16 }
 0x30d   :  { %p1469_p7 = scmp.ne.s32.totalorder %s1907_s4, %s1468_s6  ;;  %p1472_p8 = scmp.lt.u32.totalorder %s1468_s6, %s1907_s4 }
 0x30f   :  { %p1474_p9 = pnand %p1472_p8, %p1469_p7 }
 0x311   :  { %1477 = shalt.err (!%p1474_p9)
}
 0x312   :  { %840 = dma.vmem_to_hbm [thread:$0]  %s838_s24, 16, %s1907_s4, [#allocation7]  }
 0x313   :  { %s1478_s0 = scalar_lea.vmem %s1870_s26, 16  ;;  %s1482_s12 = scalar_lea.vmem %s1870_s26, 32 }
 0x314   :  { %p1479_p10 = scmp.ne.s32.totalorder %s1870_s26, %s1478_s0  ;;  %p1483_p11 = scmp.lt.s32.totalorder %s1870_s26, %s1870_s26 }
 0x315   :  { %p1484_p12 = scmp.lt.s32.totalorder %s1482_s12, %s1478_s0 }
 0x317   :  { %p1485_p13 = por %p1484_p12, %p1483_p11 }
 0x319   :  { %p1486_p0 = pnand %p1485_p13, %p1479_p10 }
 0x31b   :  { %1489 = shalt.err (!%p1486_p0)
}
 0x31c   :  { %s1490_s14 = scalar_lea.hbm %s1908_s5, 16 }
 0x31d   :  { %p1491_p1 = scmp.ne.s32.totalorder %s1908_s5, %s1490_s14  ;;  %p1494_p2 = scmp.lt.u32.totalorder %s1490_s14, %s1908_s5 }
 0x31f   :  { %p1496_p3 = pnand %p1494_p2, %p1491_p1 }
 0x321   :  { %1499 = shalt.err (!%p1496_p3)
}
 0x322   :  { %850 = dma.vmem_to_hbm [thread:$0]  %s1870_s26, 16, %s1908_s5, [#allocation7]  }
 0x323   :  { %1502 = dma.done.wait [#allocation4], 256  }
 0x324   :  { %1503 = vsyncadd [#allocation4], 4294967040 }
 0x325   :  { %1504 = dma.done.wait [#allocation7], 32  }
 0x326   :  { %1505 = vsyncadd [#allocation7], 4294967264 }
 0x327   :  { %860 = vsyncpa [#allocation3], 1 }
 0x328   :  { %861 = vsyncpa [#allocation4], 1 }
 0x329   :  { %862 = vsyncpa [#allocation7], 1 }

</bundles_post_ra>
